<compile_context>
chip_gen: v7x
topology: tpu7x:2x2x1
jax: 0.10.0
libtpu: 0.0.40
codegen_flags: <defaults>
</compile_context>

<pallas_src>
import jax
import jax.numpy as jnp
from jax.experimental import pallas as pl
from jax.experimental.pallas import tpu as pltpu


def _round_up(x, m):
    return ((x + m - 1) // m) * m


def mlp_kernel(x_ref, w1_ref, b1_ref, w2_ref, b2_ref, o_ref):
    # fc1: cast x to the MXU dtype right before the dot (hides under the MXU),
    # accumulate in f32; bias add + ReLU stay f32 on the VPU (v5e-safe).
    x = x_ref[...].astype(w1_ref.dtype)
    h = jnp.dot(x, w1_ref[...], preferred_element_type=jnp.float32)
    h = jnp.maximum(h + b1_ref[...], 0.0)

    # fc2. Lane-padding columns of w2 are zero and their bias tail is -1e30
    # (mask baked into b2 in prepare_mlp_params), so padded logits vanish in
    # the softmax with zero in-kernel masking work.
    logits = jnp.dot(h.astype(w2_ref.dtype), w2_ref[...],
                     preferred_element_type=jnp.float32) + b2_ref[...]

    # Numerically stable softmax along the last dim (f32). Exact reciprocal:
    # the approx EUP recip is too coarse for the row-sum==1 invariant.
    m = jnp.max(logits, axis=-1, keepdims=True)
    e = jnp.exp(logits - m)
    denom = jnp.sum(e, axis=-1, keepdims=True)
    o_ref[...] = (e * pl.reciprocal(denom, approx=False)).astype(o_ref.dtype)


def prepare_mlp_params(w1, b1, w2, b2, *, compute_dtype=jnp.bfloat16):
    """Pad / cast the parameters ONCE, outside the hot path.

    w1: (D_in, H), b1: (H,), w2: (H, D_out), b2: (D_out,). Weights stored as
    (in, out), so the kernel computes x @ W + b (== PyTorch x @ W.T).
    """
    D_in, H = w1.shape
    D_out = w2.shape[1]
    Hp = _round_up(H, 128)       # lane-pad hidden dim
    Dp = _round_up(D_out, 128)   # lane-pad output dim -> dense vst stores
    # TODO(synk): if compute-bound at large H/D_out on v6e/v7x, round Hp/Dp to
    # 256 instead (MXU tile is 2x256^2 there); 128 is right for small dims.

    w1_p = jnp.pad(w1, ((0, 0), (0, Hp - H))).astype(compute_dtype)
    b1_p = jnp.pad(b1.reshape(1, H).astype(jnp.float32), ((0, 0), (0, Hp - H)))
    w2_p = jnp.pad(w2, ((0, Hp - H), (0, Dp - D_out))).astype(compute_dtype)
    # Bake the padded-logit mask into the bias: padded columns get logit -1e30.
    b2_p = jnp.pad(b2.reshape(1, D_out).astype(jnp.float32),
                   ((0, 0), (0, Dp - D_out)), constant_values=-1e30)
    return dict(w1=w1_p, b1=b1_p, w2=w2_p, b2=b2_p, d_in=D_in, d_out=D_out)


def mlp_apply(x, params, *, block_b=512, out_dtype=jnp.float32,
              vmem_limit_bytes=48 * 1024 * 1024):
    """x: (B, D_in) -> softmax probabilities (B, D_out)."""
    B, D_in = x.shape
    assert D_in == params["d_in"]
    w1_p, b1_p, w2_p, b2_p = params["w1"], params["b1"], params["w2"], params["b2"]
    Hp, Dp, D_out = w1_p.shape[1], w2_p.shape[1], params["d_out"]

    # Batch tiling: keep batch padding under one tile for ragged B, and use
    # >= 2 grid steps whenever possible so both v7x TensorCores get work.
    n_tiles = max(pl.cdiv(B, block_b), 2 if B >= 16 else 1)
    tb = _round_up(pl.cdiv(B, n_tiles), 8)
    Bp = n_tiles * tb

    # Only pad x when the batch is not tile-aligned; the bf16 cast happens
    # inside the kernel so no extra HBM pass is spent on x.
    x_p = x if Bp == B else jnp.pad(x, ((0, Bp - B), (0, 0)))

    # Resident (constant index_map) operands don't need double buffering;
    # single-buffer them once the duplicate copy is a meaningful VMEM cost
    # (below that, the default pipelining is harmless).
    itemsize = jnp.dtype(w1_p.dtype).itemsize
    resident_bytes = (D_in * Hp + Hp * Dp) * itemsize + (Hp + Dp) * 4
    resident_kwargs = {}
    if resident_bytes > 4 * 1024 * 1024:
        resident_kwargs["pipeline_mode"] = pl.Buffered(1)
    # TODO(synk): if resident weights exceed ~24 MiB (v7x has 64 MiB VMEM), add
    # an Hp-reduction grid axis ("arbitrary") with an f32 VMEM accumulator
    # instead of keeping w1/w2 fully resident.

    out_p = pl.pallas_call(
        mlp_kernel,
        out_shape=jax.ShapeDtypeStruct((Bp, Dp), out_dtype),
        grid_spec=pltpu.PrefetchScalarGridSpec(
            num_scalar_prefetch=0,
            grid=(Bp // tb,),
            in_specs=[
                pl.BlockSpec((tb, D_in), lambda i: (i, 0)),   # x: pipelined over batch
                pl.BlockSpec((D_in, Hp), lambda i: (0, 0), **resident_kwargs),
                pl.BlockSpec((1, Hp), lambda i: (0, 0), **resident_kwargs),
                pl.BlockSpec((Hp, Dp), lambda i: (0, 0), **resident_kwargs),
                pl.BlockSpec((1, Dp), lambda i: (0, 0), **resident_kwargs),
            ],
            out_specs=pl.BlockSpec((tb, Dp), lambda i: (i, 0)),
        ),
        compiler_params=pltpu.CompilerParams(
            dimension_semantics=("parallel",),   # batch tiles shard across TCs (v7x)
            # 48 MiB is safe on v7x (64 MiB physical); raise toward ~100 MiB on
            # v5e/v6e (128 MiB VMEM) together with block_b for big batches.
            vmem_limit_bytes=vmem_limit_bytes,
        ),
    )(x_p, w1_p, b1_p, w2_p, b2_p)

    # Drop batch / lane padding.
    return out_p[:B, :D_out]


def mlp_forward(x, w1, b1, w2, b2, *, compute_dtype=jnp.bfloat16, **kwargs):
    """One-shot convenience wrapper (pads/casts the weights per call)."""
    params = prepare_mlp_params(w1, b1, w2, b2, compute_dtype=compute_dtype)
    return mlp_apply(x, params, **kwargs)


if __name__ == "__main__":
    # Small shapes consistent with the module (hidden_dim = 25 in the source).
    batch = 8
    input_dim = 16
    hidden_dim = 25
    output_dim = 4

    key = jax.random.PRNGKey(0)
    kx, kw1, kb1, kw2, kb2 = jax.random.split(key, 5)

    x = jax.random.normal(kx, (batch, input_dim), dtype=jnp.float32)

    # nn.init.uniform_ on weights -> U(0, 1); biases keep the default Linear
    # init U(-1/sqrt(fan_in), 1/sqrt(fan_in)). Weights stored as (in, out).
    w1 = jax.random.uniform(kw1, (input_dim, hidden_dim), dtype=jnp.float32)
    b1 = jax.random.uniform(kb1, (hidden_dim,), dtype=jnp.float32,
                            minval=-1.0 / jnp.sqrt(input_dim),
                            maxval=1.0 / jnp.sqrt(input_dim))
    w2 = jax.random.uniform(kw2, (hidden_dim, output_dim), dtype=jnp.float32)
    b2 = jax.random.uniform(kb2, (output_dim,), dtype=jnp.float32,
                            minval=-1.0 / jnp.sqrt(hidden_dim),
                            maxval=1.0 / jnp.sqrt(hidden_dim))

    params = prepare_mlp_params(w1, b1, w2, b2)   # pad/cast once, reuse
    out = mlp_apply(x, params)
    jax.block_until_ready(out)

    # Reference with matching precision: bf16 MXU inputs, f32 accumulation,
    # exact softmax normalization.
    xb, w1b, w2b = (a.astype(jnp.bfloat16) for a in (x, w1, w2))
    h_ref = jnp.maximum(
        jnp.dot(xb, w1b, preferred_element_type=jnp.float32) + b1[None, :], 0.0)
    logits_ref = jnp.dot(h_ref.astype(jnp.bfloat16), w2b,
                         preferred_element_type=jnp.float32) + b2[None, :]
    ref = jax.nn.softmax(logits_ref, axis=-1)

    assert out.shape == (batch, output_dim)
    max_err = float(jnp.max(jnp.abs(out - ref)))
    assert jnp.allclose(out, ref, atol=5e-3, rtol=5e-3), max_err
    # Exact normalization -> rows sum to 1 within f32 rounding.
    assert jnp.allclose(jnp.sum(out, axis=-1), 1.0, atol=1e-3)

    print("KERNEL_OK")
</pallas_src>

<mosaic_0001>
module attributes {stable_mosaic.version = 11 : i64} {
  func.func @mlp_kernel(%arg0: i32, %arg1: memref<8x16xf32, #tpu.memory_space<vmem>>, %arg2: memref<16x128xbf16, #tpu.memory_space<vmem>>, %arg3: memref<1x128xf32, #tpu.memory_space<vmem>>, %arg4: memref<128x128xbf16, #tpu.memory_space<vmem>>, %arg5: memref<1x128xf32, #tpu.memory_space<vmem>>, %arg6: memref<8x128xf32, #tpu.memory_space<vmem>>) attributes {dimension_semantics = [#tpu.dimension_semantics<parallel>], iteration_bounds = array<i64: 1>, scalar_prefetch = 0 : i64, scratch_operands = 0 : i64, tpu.core_type = #tpu.core_type<tc>, window_params = [{transform_indices = @transform_0, window_bounds = array<i64: 8, 16>}, {pipeline_mode = #tpu.pipeline_mode<synchronous>, transform_indices = @transform_1, window_bounds = array<i64: 16, 128>}, {pipeline_mode = #tpu.pipeline_mode<synchronous>, transform_indices = @transform_2, window_bounds = array<i64: 1, 128>}, {pipeline_mode = #tpu.pipeline_mode<synchronous>, transform_indices = @transform_3, window_bounds = array<i64: 128, 128>}, {pipeline_mode = #tpu.pipeline_mode<synchronous>, transform_indices = @transform_4, window_bounds = array<i64: 1, 128>}, {transform_indices = @transform_5, window_bounds = array<i64: 8, 128>}]} {
    %c0 = arith.constant 0 : index
    %c0_0 = arith.constant 0 : index
    %0 = vector.load %arg1[%c0, %c0_0] : memref<8x16xf32, #tpu.memory_space<vmem>>, vector<8x16xf32>
    %1 = arith.truncf %0 : vector<8x16xf32> to vector<8x16xbf16>
    %c0_1 = arith.constant 0 : index
    %c0_2 = arith.constant 0 : index
    %2 = vector.load %arg2[%c0_1, %c0_2] : memref<16x128xbf16, #tpu.memory_space<vmem>>, vector<16x128xbf16>
    %cst = arith.constant dense<0.000000e+00> : vector<8x128xf32>
    %3 = tpu.matmul %1, %2, %cst {dimension_numbers = #tpu.dot_dimension_numbers<[1], [0], [0], [1], [0, 0, 1, 1], [], []>} : vector<8x16xbf16>, vector<16x128xbf16>, vector<8x128xf32> -> vector<8x128xf32>
    %c0_3 = arith.constant 0 : index
    %c0_4 = arith.constant 0 : index
    %4 = vector.load %arg3[%c0_3, %c0_4] : memref<1x128xf32, #tpu.memory_space<vmem>>, vector<1x128xf32>
    %5 = vector.broadcast %4 : vector<1x128xf32> to vector<8x128xf32>
    %6 = arith.addf %3, %5 : vector<8x128xf32>
    %cst_5 = arith.constant 0.000000e+00 : f32
    %7 = vector.broadcast %cst_5 : f32 to vector<8x128xf32>
    %8 = arith.maximumf %6, %7 : vector<8x128xf32>
    %9 = arith.truncf %8 : vector<8x128xf32> to vector<8x128xbf16>
    %c0_6 = arith.constant 0 : index
    %c0_7 = arith.constant 0 : index
    %10 = vector.load %arg4[%c0_6, %c0_7] : memref<128x128xbf16, #tpu.memory_space<vmem>>, vector<128x128xbf16>
    %cst_8 = arith.constant dense<0.000000e+00> : vector<8x128xf32>
    %11 = tpu.matmul %9, %10, %cst_8 {dimension_numbers = #tpu.dot_dimension_numbers<[1], [0], [0], [1], [0, 0, 1, 1], [], []>} : vector<8x128xbf16>, vector<128x128xbf16>, vector<8x128xf32> -> vector<8x128xf32>
    %c0_9 = arith.constant 0 : index
    %c0_10 = arith.constant 0 : index
    %12 = vector.load %arg5[%c0_9, %c0_10] : memref<1x128xf32, #tpu.memory_space<vmem>>, vector<1x128xf32>
    %13 = vector.broadcast %12 : vector<1x128xf32> to vector<8x128xf32>
    %14 = arith.addf %11, %13 : vector<8x128xf32>
    %cst_11 = arith.constant dense<0xFF800000> : vector<8xf32>
    %15 = vector.multi_reduction <maximumf>, %14, %cst_11 [1] : vector<8x128xf32> to vector<8xf32>
    %16 = vector.shape_cast %15 : vector<8xf32> to vector<8x1xf32>
    %17 = vector.broadcast %16 : vector<8x1xf32> to vector<8x128xf32>
    %18 = arith.subf %14, %17 : vector<8x128xf32>
    %19 = math.exp %18 : vector<8x128xf32>
    %cst_12 = arith.constant dense<0.000000e+00> : vector<8xf32>
    %20 = vector.multi_reduction <add>, %19, %cst_12 [1] : vector<8x128xf32> to vector<8xf32>
    %21 = vector.shape_cast %20 : vector<8xf32> to vector<8x1xf32>
    %22 = tpu.reciprocal %21 : vector<8x1xf32> -> vector<8x1xf32>
    %23 = vector.broadcast %22 : vector<8x1xf32> to vector<8x128xf32>
    %24 = arith.mulf %19, %23 : vector<8x128xf32>
    %c0_13 = arith.constant 0 : index
    %c0_14 = arith.constant 0 : index
    %25 = vector.load %arg6[%c0_13, %c0_14] : memref<8x128xf32, #tpu.memory_space<vmem>>, vector<8x128xf32>
    tpu.vector_store %arg6[%c0_13, %c0_14], %24 {strides = array<i32>} : memref<8x128xf32, #tpu.memory_space<vmem>>, vector<8x128xf32>,
    return
  }
  func.func @transform_0(%arg0: i32) -> (i32, i32) {
    %c0_i32 = arith.constant 0 : i32
    %c0_i32_0 = arith.constant 0 : i32
    return %arg0, %c0_i32 : i32, i32
  }
  func.func @transform_1(%arg0: i32) -> (i32, i32) {
    %c0_i32 = arith.constant 0 : i32
    %c0_i32_0 = arith.constant 0 : i32
    %c0_i32_1 = arith.constant 0 : i32
    return %c0_i32, %c0_i32_0 : i32, i32
  }
  func.func @transform_2(%arg0: i32) -> (i32, i32) {
    %c0_i32 = arith.constant 0 : i32
    %c0_i32_0 = arith.constant 0 : i32
    %c0_i32_1 = arith.constant 0 : i32
    return %c0_i32, %c0_i32_0 : i32, i32
  }
  func.func @transform_3(%arg0: i32) -> (i32, i32) {
    %c0_i32 = arith.constant 0 : i32
    %c0_i32_0 = arith.constant 0 : i32
    %c0_i32_1 = arith.constant 0 : i32
    return %c0_i32, %c0_i32_0 : i32, i32
  }
  func.func @transform_4(%arg0: i32) -> (i32, i32) {
    %c0_i32 = arith.constant 0 : i32
    %c0_i32_0 = arith.constant 0 : i32
    %c0_i32_1 = arith.constant 0 : i32
    return %c0_i32, %c0_i32_0 : i32, i32
  }
  func.func @transform_5(%arg0: i32) -> (i32, i32) {
    %c0_i32 = arith.constant 0 : i32
    %c0_i32_0 = arith.constant 0 : i32
    return %arg0, %c0_i32 : i32, i32
  }
}

</mosaic_0001>

<bundles_post_ra>
// kernel: tpu_custom_call.1
= control target key start
LH: loop header
LB: loop body
LE: loop exit
PB: predicated region body
PF: predicated region fallthrough
CT: control target
= control target key end

     0   :  { %10 = vsyncpa [#allocation3], 0  ;;  %s523_s0 = inlined_call_operand.hbm [shape: f32[8,16], index: 0, kind: input, shape index: {}]   ;;  %s524_s1 = inlined_call_operand.hbm [shape: bf16[16,128], index: 1, kind: input, shape index: {}]   ;;  %s525_s2 = inlined_call_operand.vmem [shape: f32[1,128], index: 2, kind: input, shape index: {}]   ;;  %s526_s3 = inlined_call_operand.hbm [shape: bf16[128,128], index: 3, kind: input, shape index: {}]   ;;  %s527_s4 = inlined_call_operand.vmem [shape: f32[1,128], index: 4, kind: input, shape index: {}]   ;;  %s528_s5 = inlined_call_operand.hbm [shape: f32[8,128], index: 5, kind: output, shape index: {}]  }
   0x1   :  { %11 = vsyncpa [#allocation6], 0 }
   0x2   :  { %12 = vsyncpa [#allocation4], 0  ;;  %s425_s18 = smov [#allocation5]   ;;  %s331_s22 = scalar_lea.hbm %s524_s1, 128 }
   0x3   :  { %s28_s19 = sshll.u32 %s425_s18, 4  ;;  %p332_p0 = scmp.ne.s32.totalorder %s524_s1, %s331_s22  ;;  %s29_s19 = int_to_ptr.vmem [resolvable:$true] %s28_s19 }
   0x4   :  { %p335_p1 = scmp.lt.u32.totalorder %s331_s22, %s524_s1 }
   0x6   :  { %p337_p2 = pnand %p335_p1, %p332_p0 }
   0x8   :  { %340 = shalt.err (!%p337_p2)
}
   0x9   :  { %s341_s27 = scalar_lea.vmem %s29_s19, 128  ;;  %p346_p4 = scmp.lt.s32.totalorder %s29_s19, %s29_s19 }
   0xa   :  { %p342_p3 = scmp.ne.s32.totalorder %s29_s19, %s341_s27  ;;  %p347_p5 = scmp.lt.s32.totalorder %s341_s27, %s341_s27 }
   0xc   :  { %p348_p6 = por %p347_p5, %p346_p4 }
   0xe   :  { %p349_p7 = pnand %p348_p6, %p342_p3 }
  0x10   :  { %352 = shalt.err (!%p349_p7)
}
  0x11   :  { %s426_s28 = smov 64   ;;  %s427_s29 = smov 4  }
  0x12   :  { %34 = dma.hbm_to_vmem [thread:$0]  %s524_s1, 128, %s29_s19, [#allocation6], %s426_s28, %s426_s28, %s427_s29  }
  0x13   :  { %s428_s7 = smov [#allocation2]   ;;  %s429_s9 = smov [#allocation7]  }
  0x14   :  { %s19_s8 = sshll.u32 %s428_s7, 4  ;;  %s42_s10 = sshll.u32 %s429_s9, 4  ;;  %s20_s8 = int_to_ptr.vmem [resolvable:$true] %s19_s8  ;;  %s43_s10 = int_to_ptr.vmem [resolvable:$true] %s42_s10 }
  0x15   :  { %s353_s13 = scalar_lea.hbm %s523_s0, 128 }
  0x16   :  { %p354_p8 = scmp.ne.s32.totalorder %s523_s0, %s353_s13  ;;  %p357_p9 = scmp.lt.u32.totalorder %s353_s13, %s523_s0 }
  0x18   :  { %p359_p10 = pnand %p357_p9, %p354_p8 }
  0x1a   :  { %362 = shalt.err (!%p359_p10)
}
  0x1b   :  { %s363_s1 = scalar_lea.vmem %s20_s8, 128  ;;  %p368_p12 = scmp.lt.s32.totalorder %s20_s8, %s20_s8 }
  0x1c   :  { %p364_p11 = scmp.ne.s32.totalorder %s20_s8, %s363_s1  ;;  %p369_p13 = scmp.lt.s32.totalorder %s363_s1, %s363_s1 }
  0x1e   :  { %p370_p0 = por %p369_p13, %p368_p12 }
  0x20   :  { %p371_p1 = pnand %p370_p0, %p364_p11 }
  0x22   :  { %374 = shalt.err (!%p371_p1)
}
  0x23   :  { %22 = dma.hbm_to_vmem [thread:$0]  %s523_s0, 128, %s20_s8, [#allocation3]  }
  0x24   :  { %s375_s22 = scalar_lea.hbm %s526_s3, 1024 }
  0x25   :  { %p376_p2 = scmp.ne.s32.totalorder %s526_s3, %s375_s22  ;;  %p379_p3 = scmp.lt.u32.totalorder %s375_s22, %s526_s3 }
  0x27   :  { %p381_p4 = pnand %p379_p3, %p376_p2 }
  0x29   :  { %384 = shalt.err (!%p381_p4)
}
  0x2a   :  { %s385_s27 = scalar_lea.vmem %s43_s10, 1024  ;;  %p390_p6 = scmp.lt.s32.totalorder %s43_s10, %s43_s10 }
  0x2b   :  { %p386_p5 = scmp.ne.s32.totalorder %s43_s10, %s385_s27  ;;  %p391_p7 = scmp.lt.s32.totalorder %s385_s27, %s385_s27 }
  0x2d   :  { %p392_p8 = por %p391_p7, %p390_p6 }
  0x2f   :  { %p393_p9 = pnand %p392_p8, %p386_p5 }
  0x31   :  { %396 = shalt.err (!%p393_p9)
}
  0x32   :  { %48 = dma.hbm_to_vmem [thread:$0]  %s526_s3, 1024, %s43_s10, [#allocation6], %s426_s28, %s426_s28, %s427_s29  }
  0x33   :  { %419 = dma.done.wait [#allocation3], 128  }
  0x34   :  { %420 = vsyncadd [#allocation3], 4294967168 }
  0x35   :  { %421 = dma.done.wait [#allocation6], 1152  }
  0x36   :  { %422 = vsyncadd [#allocation6], 4294966144  ;;  %v430_v0 = vmov 0.0   ;;  %vm431_vm0 = vmmov 0   ;;  %v318_v1 = vld [vmem:[#allocation5] sm:$0xff]   ;;  %v61_v2 = vld [vmem:[#allocation2] sm:$0xff] }
  0x37   :  { %284 = vmatprep.subr.bf16.mxu0 %v430_v0  ;;  %286 = vmatprep.mubr.msk.bf16.mxu0 %vm431_vm0, %v430_v0  ;;  %v62_v3 = vpack.c.bf16 %v61_v2, %v61_v2  ;;  %vm78_vm1 = vcmask 130048   ;;  %v319_v4 = vld [vmem:[#allocation7] sm:$0xff]   ;;  %v320_v5 = vld [vmem:[#allocation7 + $0x8] sm:$0xff]   ;;  %v321_v6 = vld [vmem:[#allocation7 + $0x10] sm:$0xff]  }
  0x38   :  { %290 = vmatprep.subr.bf16.mxu1 %v430_v0  ;;  %306 = vmatprep.mubr.msk.bf16.mxu1 %vm431_vm0, %v430_v0  ;;  %v322_v7 = vld [vmem:[#allocation7 + $0x18] sm:$0xff]   ;;  %v323_v8 = vld [vmem:[#allocation7 + $0x20] sm:$0xff]   ;;  %v324_v9 = vld [vmem:[#allocation7 + $0x28] sm:$0xff]  }
  0x39   :  { %285 = vmatpush3.bf16.msra.mxu0 %v318_v1  ;;  %291 = vmatpush3.bf16.msra.mxu1 %v319_v4  ;;  %v325_v10 = vld [vmem:[#allocation7 + $0x30] sm:$0xff]   ;;  %v326_v11 = vld [vmem:[#allocation7 + $0x38] sm:$0xff]  }
  0x3a   :  { %292 = vmatprep.subr.bf16.mxu1 %v430_v0  ;;  %v261_v12 = vld [vmem:[%s525_s2] ss:$0 sm:$0xff]  ;;  %s432_s2 = smov [#allocation8]  }
  0x3b   :  { %v264_v20 = vld [vmem:[%s527_s4] ss:$0 sm:$0xff]  ;;  %s251_s7 = sshll.u32 %s432_s2, 4  ;;  %s252_s7 = int_to_ptr.vmem [resolvable:$true] %s251_s7 }
  0x3c   :  { %287 = vmatmul.mubr.msk.bf16.vlgmr.msra.gmra.mrb[0].mxu0 %vm78_vm1, %v62_v3  ;;  %s397_s4 = scalar_lea.vmem %s252_s7, 128  ;;  %p402_p11 = scmp.lt.s32.totalorder %s252_s7, %s252_s7 }
  0x3d   :  { %293 = vmatpush3.bf16.msra.mxu1 %v320_v5  ;;  %p398_p10 = scmp.ne.s32.totalorder %s252_s7, %s397_s4  ;;  %p403_p12 = scmp.lt.s32.totalorder %s397_s4, %s397_s4 }
  0x3e   :  { %294 = vmatprep.subr.bf16.mxu1 %v430_v0 }
  0x3f   :  { %p404_p13 = por %p403_p12, %p402_p11 }
  0x41   :  { %295 = vmatpush3.bf16.msra.mxu1 %v321_v6  ;;  %p405_p0 = pnand %p404_p13, %p398_p10 }
  0x42   :  { %296 = vmatprep.subr.bf16.mxu1 %v430_v0 }
  0x45   :  { %297 = vmatpush3.bf16.msra.mxu1 %v322_v7 }
  0x46   :  { %298 = vmatprep.subr.bf16.mxu1 %v430_v0 }
  0x49   :  { %299 = vmatpush3.bf16.msra.mxu1 %v323_v8 }
  0x4a   :  { %300 = vmatprep.subr.bf16.mxu1 %v430_v0 }
  0x4d   :  { %301 = vmatpush3.bf16.msra.mxu1 %v324_v9 }
  0x4e   :  { %302 = vmatprep.subr.bf16.mxu1 %v430_v0 }
  0x51   :  { %303 = vmatpush3.bf16.msra.mxu1 %v325_v10 }
  0x52   :  { %304 = vmatprep.subr.bf16.mxu1 %v430_v0 }
  0x55   :  { %305 = vmatpush3.bf16.msra.mxu1 %v326_v11 }
 0x10f   :  { %v116_v13 = vpop.f32.mrb[0].mxu0 }
 0x110   :  { %v117_v14 = vadd.f32 %v261_v12, %v116_v13  ;;  %v288_v15 = vpop.f32.mrb[1].mxu0 }
 0x111   :  { %v119_v16 = vpop.f32.mrb[2].mxu0 }
 0x112   :  { %v122_v17 = vmax.f32 %v117_v14, 0.0  ;;  %v289_v18 = vpop.f32.mrb[3].mxu0 }
 0x114   :  { %v123_v19 = vpack.c.bf16 %v122_v17, %v122_v17 }
 0x116   :  { %307 = vmatmul.mubr.bf16.vlgmr.msra.gmra.mrb[0].mxu1 %v123_v19 }
 0x1e9   :  { %v229_v21 = vpop.f32.mrb[0].mxu1 }
 0x1ea   :  { %v230_v22 = vadd.f32 %v264_v20, %v229_v21  ;;  %v308_v23 = vpop.f32.mrb[1].mxu1 }
 0x1eb   :  { %v232_v24 = vpop.f32.mrb[2].mxu1 }
 0x1ec   :  { %235 = vmax.xlane.f32.xlu0 %v230_v22  ;;  %v309_v25 = vpop.f32.mrb[3].mxu1 }
 0x279   :  { %v236_v26 = vpop.xlane.xlu0 %235 }
 0x27a   :  { %v237_v27 = vsub.f32 %v230_v22, %v236_v26 }
 0x27c   :  { %v238_v28 = vmul.f32 1.442695, %v237_v27 }
 0x27e   :  { %327 = vpow2.f32 %v238_v28 }
 0x288   :  { %v328_v29 = vpop.eup %327 }
 0x289   :  { %240 = vadd.xlane.f32.xlu0 %v328_v29 }
 0x316   :  { %v241_v30 = vpop.xlane.xlu0 %240 }
 0x317   :  { %329 = vrcp.f32 %v241_v30 }
 0x321   :  { %v330_v31 = vpop.eup %329 }
 0x322   :  { %v243_v32 = vmul.f32 %v330_v31, %v328_v29 }
 0x324   :  { %244 = vst [vmem:[#allocation8] sm:$0xff] %v243_v32 }
 0x325   :  { %408 = shalt.err (!%p405_p0)
}
 0x326   :  { %s409_s10 = scalar_lea.hbm %s528_s5, 128 }
 0x327   :  { %p410_p1 = scmp.ne.s32.totalorder %s528_s5, %s409_s10  ;;  %p413_p2 = scmp.lt.u32.totalorder %s409_s10, %s528_s5 }
 0x329   :  { %p415_p3 = pnand %p413_p2, %p410_p1 }
 0x32b   :  { %418 = shalt.err (!%p415_p3)
}
 0x32c   :  { %254 = dma.vmem_to_hbm [thread:$0]  %s252_s7, 128, %s528_s5, [#allocation4]  }
 0x32d   :  { %423 = dma.done.wait [#allocation4], 128  }
 0x32e   :  { %424 = vsyncadd [#allocation4], 4294967168 }
 0x32f   :  { %258 = vsyncpa [#allocation3], 1 }
 0x330   :  { %259 = vsyncpa [#allocation6], 1 }
 0x331   :  { %260 = vsyncpa [#allocation4], 1 }

</bundles_post_ra>
